<compile_context>
chip_gen: v6e
topology: v6e:2x2x1
jax: 0.10.0
libtpu: 0.0.40
codegen_flags: <defaults>
</compile_context>

<pallas_src>
import functools

import jax
import jax.numpy as jnp
from jax import lax
from jax.experimental import pallas as pl
from jax.experimental.pallas import tpu as pltpu


# ----------------------------------------------------------------------------
# small helpers
# ----------------------------------------------------------------------------
def _round_up(x, m):
    return (x + m - 1) // m * m


@functools.lru_cache(maxsize=None)
def _vmem_limit_bytes():
    """v5e/v6e have 128 MiB VMEM -> use a big scoped limit; otherwise (incl.
    v7x with 64 MiB per TensorCore) stay at a conservative 48 MiB."""
    try:
        kind = jax.devices()[0].device_kind.lower()
    except Exception:
        kind = ""
    if "v5" in kind or "v6" in kind:
        return 100 * 1024 * 1024
    return 48 * 1024 * 1024


def _shift_rows(x, k):
    """result[m, :] = x[m + k, :]; rows shifted in from outside are zero."""
    if k == 0:
        return x
    r = x.shape[0]
    pad = jnp.zeros((abs(k), x.shape[1]), x.dtype)
    if k > 0:
        return jnp.concatenate([x[k:], pad], axis=0)
    return jnp.concatenate([pad, x[:r + k]], axis=0)


def _tap(plane, dr, dc, wo, m_out, pix):
    """3x3-conv tap.  Rows of `plane` are the row-major (ho, wo) pixels of Nb
    images stacked along rows (batch-major).  Returns t with
    t[m] = plane[pixel of row m shifted by (dr, dc) inside its own image],
    zero where the shifted pixel falls outside the image (zero padding)."""
    t = _shift_rows(plane, dr * wo + dc)
    cond = None
    if dr == -1:
        cond = pix >= wo
    elif dr == 1:
        cond = pix < (m_out - wo)
    if dc != 0:
        ow = (pix & (wo - 1)) if (wo & (wo - 1)) == 0 else (pix % wo)
        c = (ow >= 1) if dc == -1 else (ow <= wo - 2)
        cond = c if cond is None else (cond & c)
    if cond is None:
        return t
    return jnp.where(cond, t, jnp.zeros_like(t))


# ----------------------------------------------------------------------------
# Pallas kernels
# ----------------------------------------------------------------------------
def _mm_bn_kernel(relu, x_ref, w_ref, s_ref, b_ref, o_ref):
    """out = maybe_relu((x @ w) * scale + bias) for one row tile (stem conv)."""
    y = jnp.dot(x_ref[...], w_ref[...], preferred_element_type=jnp.float32)
    y = y * s_ref[...] + b_ref[...]
    if relu:
        y = jnp.maximum(y, 0.0)
    o_ref[...] = y.astype(o_ref.dtype)


def _bottleneck_kernel(stride, has_proj, wo, m_out, nb, *refs):
    """Fully fused Bottleneck block for a batch slab of nb images."""
    if has_proj:
        (x_ref, w1_ref, s1_ref, b1_ref, w2_ref, s2_ref, b2_ref,
         w3_ref, s3_ref, b3_ref, ws_ref, ss_ref, bs_ref, o_ref) = refs
    else:
        (x_ref, w1_ref, s1_ref, b1_ref, w2_ref, s2_ref, b2_ref,
         w3_ref, s3_ref, b3_ref, o_ref) = refs

    f32, bf16 = jnp.float32, jnp.bfloat16
    cin = w1_ref.shape[0]
    p = w1_ref.shape[1]
    e = w3_ref.shape[1]
    r_out = nb * m_out                               # output rows this grid step
    r_in = r_out * (4 if stride == 2 else 1)         # polyphase planes for s=2

    # batch (and polyphase planes) folded into the matmul M dimension
    x = x_ref[...].reshape(r_in, cin)

    # conv1 (1x1) + bn1 + relu over all rows at once
    h1 = jnp.dot(x, w1_ref[...], preferred_element_type=f32)
    h1 = jnp.maximum(h1 * s1_ref[...] + b1_ref[...], 0.0).astype(bf16)

    row = lax.broadcasted_iota(jnp.int32, (r_out, 1), 0)
    pix = (row & (m_out - 1)) if (m_out & (m_out - 1)) == 0 else (row % m_out)

    # conv2 (3x3, pad 1, stride) = 3 K-packed matmuls (r_out, 3p)@(3p, p) over
    # row-shifted taps; per-image masks keep taps from leaking across images.
    acc = jnp.zeros((r_out, p), f32)
    for ki in range(3):
        taps = []
        for kj in range(3):
            if stride == 1:
                plane, dr, dc = h1, ki - 1, kj - 1
            else:
                q = 2 * (1 - ki % 2) + (1 - kj % 2)          # polyphase plane
                plane = h1[q * r_out:(q + 1) * r_out]
                dr = -1 if ki == 0 else 0
                dc = -1 if kj == 0 else 0
            taps.append(_tap(plane, dr, dc, wo, m_out, pix))
        acc = acc + jnp.dot(jnp.concatenate(taps, axis=1), w2_ref[ki],
                            preferred_element_type=f32)
    h2 = jnp.maximum(acc * s2_ref[...] + b2_ref[...], 0.0).astype(bf16)

    # conv3 (1x1) + bn3 + shortcut + relu
    y = jnp.dot(h2, w3_ref[...], preferred_element_type=f32)
    y = y * s3_ref[...] + b3_ref[...]
    x_sc = x[:r_out] if stride == 2 else x           # x[::2, ::2] == plane 0
    if has_proj:
        sc = jnp.dot(x_sc, ws_ref[...], preferred_element_type=f32)
        sc = sc * ss_ref[...] + bs_ref[...]
    else:
        sc = x_sc.astype(f32)                        # identity shortcut (Cin == E)
    o_ref[...] = jnp.maximum(y + sc, 0.0).reshape(nb, m_out, e).astype(o_ref.dtype)


def _head_kernel(x_ref, w_ref, b_ref, o_ref):
    """Global average pool (4x4 spatial) + linear classifier."""
    pooled = jnp.mean(x_ref[...].astype(jnp.float32), axis=1)        # (N, C)
    y = jnp.dot(pooled.astype(jnp.bfloat16), w_ref[...],
                preferred_element_type=jnp.float32) + b_ref[...]
    o_ref[...] = y


# ----------------------------------------------------------------------------
# Pallas wrappers
# ----------------------------------------------------------------------------
def matmul_bn(x, w, scale, bias, *, relu=True, out_dtype=jnp.bfloat16, tile_m=512):
    """Tiled fused matmul + folded BN (+ReLU); rows padded to the tile size."""
    m, k = x.shape
    n = w.shape[1]
    kp = _round_up(k, 32)                     # pad contraction (stem K=27 -> 32)
    if kp != k:
        x = jnp.pad(x, ((0, 0), (0, kp - k)))
        w = jnp.pad(w, ((0, kp - k), (0, 0)))
    tm = min(tile_m, _round_up(m, 8))
    mp = _round_up(m, tm)
    if mp != m:
        x = jnp.pad(x, ((0, mp - m), (0, 0)))
    out = pl.pallas_call(
        functools.partial(_mm_bn_kernel, relu),
        out_shape=jax.ShapeDtypeStruct((mp, n), out_dtype),
        grid_spec=pltpu.PrefetchScalarGridSpec(
            num_scalar_prefetch=0,
            grid=(mp // tm,),
            in_specs=[pl.BlockSpec((tm, kp), lambda i: (i, 0)),
                      pl.BlockSpec((kp, n), lambda i: (0, 0)),
                      pl.BlockSpec((1, n), lambda i: (0, 0)),
                      pl.BlockSpec((1, n), lambda i: (0, 0))],
            out_specs=pl.BlockSpec((tm, n), lambda i: (i, 0))),
        compiler_params=pltpu.CompilerParams(
            dimension_semantics=("parallel",),
            vmem_limit_bytes=_vmem_limit_bytes()),
    )(x.astype(jnp.bfloat16), w.astype(jnp.bfloat16),
      scale.reshape(1, n), bias.reshape(1, n))
    return out[:m] if mp != m else out


def bottleneck_block(x_nhwc, blk, *, rows_target=1024, max_nb=32):
    """One fused Bottleneck block (bf16 NHWC in -> bf16 NHWC out)."""
    n, h, w, cin = x_nhwc.shape
    stride = blk["stride"]
    has_proj = "ws" in blk
    p = blk["w1"].shape[1]
    e = blk["w3"].shape[1]

    ho, wo = h // stride, w // stride
    m_out = ho * wo

    # Fold the batch into the matmul M dimension: nb images per grid step so the
    # deep stages (m_out = 64 / 16) still feed the MXU hundreds of rows, and the
    # weight DMA is amortized across nb images.  Keep >=2 grid steps when n>=2
    # so both v7x TensorCores get work.
    nb = max(1, min(n, max_nb, rows_target // max(m_out, 1)))
    if nb >= n and n > 1:
        nb = (n + 1) // 2
    n_pad = _round_up(n, nb)
    grid = n_pad // nb

    if stride == 1:
        x2 = x_nhwc.reshape(n, m_out, cin)
        if n_pad != n:
            x2 = jnp.pad(x2, ((0, n_pad - n), (0, 0), (0, 0)))
        x_spec = pl.BlockSpec((nb, m_out, cin), lambda i: (i, 0, 0))
    else:
        # Polyphase reorder (cheap XLA pass): plane q = 2a+b holds pixels
        # (2r+a, 2c+b).  Plane axis leading keeps every plane contiguous after
        # batch folding, and plane 0 is exactly x[::2, ::2] for the shortcut.
        x2 = (x_nhwc.reshape(n, ho, 2, wo, 2, cin)
              .transpose(2, 4, 0, 1, 3, 5)
              .reshape(4, n, m_out, cin))
        if n_pad != n:
            x2 = jnp.pad(x2, ((0, 0), (0, n_pad - n), (0, 0), (0, 0)))
        x_spec = pl.BlockSpec((4, nb, m_out, cin), lambda i: (0, i, 0, 0))

    w2 = blk["w2"].reshape(3, 3 * p, p)       # K-packed taps: (ki, kj*in, out)

    def const_spec(shape):
        return pl.BlockSpec(shape, lambda i: (0,) * len(shape))

    inputs = [x2, blk["w1"], blk["s1"], blk["b1"], w2, blk["s2"], blk["b2"],
              blk["w3"], blk["s3"], blk["b3"]]
    in_specs = [
        x_spec,
        const_spec((cin, p)), const_spec((1, p)), const_spec((1, p)),
        const_spec((3, 3 * p, p)), const_spec((1, p)), const_spec((1, p)),
        const_spec((p, e)), const_spec((1, e)), const_spec((1, e)),
    ]
    if has_proj:
        inputs += [blk["ws"], blk["ss"], blk["bs"]]
        in_specs += [const_spec((cin, e)), const_spec((1, e)), const_spec((1, e))]

    rows_in = m_out * (4 if stride == 2 else 1)
    flops_per_im = 2 * (rows_in * cin * p + m_out * 9 * p * p + m_out * p * e
                        + (m_out * cin * e if has_proj else 0))
    weight_bytes = sum(int(a.size) * a.dtype.itemsize for a in inputs[1:])
    bytes_accessed = (int(x2.size) * x2.dtype.itemsize
                      + int(n_pad) * m_out * e * 2 + weight_bytes)
    cost = pl.CostEstimate(flops=int(n_pad) * flops_per_im,
                           transcendentals=0,
                           bytes_accessed=int(bytes_accessed))

    out = pl.pallas_call(
        functools.partial(_bottleneck_kernel, stride, has_proj, wo, m_out, nb),
        out_shape=jax.ShapeDtypeStruct((n_pad, m_out, e), jnp.bfloat16),
        grid_spec=pltpu.PrefetchScalarGridSpec(
            num_scalar_prefetch=0,
            grid=(grid,),
            in_specs=in_specs,
            out_specs=pl.BlockSpec((nb, m_out, e), lambda i: (i, 0, 0))),
        compiler_params=pltpu.CompilerParams(
            dimension_semantics=("parallel",),
            vmem_limit_bytes=_vmem_limit_bytes()),
        cost_estimate=cost,
    )(*inputs)
    return out[:n].reshape(n, ho, wo, e)


def avgpool_linear(x_nsc, w, b):
    n, s, c = x_nsc.shape
    ncls = w.shape[1]
    return pl.pallas_call(
        _head_kernel,
        out_shape=jax.ShapeDtypeStruct((n, ncls), jnp.float32),
        grid_spec=pltpu.PrefetchScalarGridSpec(
            num_scalar_prefetch=0,
            grid=(1,),
            in_specs=[pl.BlockSpec((n, s, c), lambda i: (0, 0, 0)),
                      pl.BlockSpec((c, ncls), lambda i: (0, 0)),
                      pl.BlockSpec((1, ncls), lambda i: (0, 0))],
            out_specs=pl.BlockSpec((n, ncls), lambda i: (0, 0))),
        compiler_params=pltpu.CompilerParams(
            dimension_semantics=("arbitrary",),
            vmem_limit_bytes=_vmem_limit_bytes()),
    )(x_nsc.astype(jnp.bfloat16), w.astype(jnp.bfloat16), b)


# ----------------------------------------------------------------------------
# JAX glue: stem im2col (3 channels only), parameter init, full forward
# ----------------------------------------------------------------------------
def _im2col_3x3(x_nhwc):
    n, h, w, c = x_nhwc.shape
    xp = jnp.pad(x_nhwc, ((0, 0), (1, 1), (1, 1), (0, 0)))
    cols = [xp[:, ki:ki + h, kj:kj + w, :] for ki in range(3) for kj in range(3)]
    return jnp.concatenate(cols, axis=-1).reshape(n * h * w, 9 * c)


def _fold_bn_params(key, c):
    kg, kb, km, kv = jax.random.split(key, 4)
    gamma = jax.random.uniform(kg, (c,), jnp.float32, 0.5, 1.5)
    beta = 0.1 * jax.random.normal(kb, (c,), jnp.float32)
    mean = 0.1 * jax.random.normal(km, (c,), jnp.float32)
    var = jax.random.uniform(kv, (c,), jnp.float32, 0.5, 1.5)
    scale = gamma / jnp.sqrt(var + 1e-5)
    bias = beta - mean * scale
    return scale.reshape(1, c), bias.reshape(1, c)


def _init_block(key, cin, planes, stride):
    e = 4 * planes
    ks = jax.random.split(key, 8)

    def he(k, shape, fan_in):
        return (jax.random.normal(k, shape, jnp.float32)
                * (2.0 / fan_in) ** 0.5).astype(jnp.bfloat16)

    blk = {"stride": stride}
    blk["w1"] = he(ks[0], (cin, planes), cin)
    blk["s1"], blk["b1"] = _fold_bn_params(ks[1], planes)
    blk["w2"] = he(ks[2], (3, 3, planes, planes), 9 * planes)      # HWIO
    blk["s2"], blk["b2"] = _fold_bn_params(ks[3], planes)
    blk["w3"] = he(ks[4], (planes, e), planes)
    blk["s3"], blk["b3"] = _fold_bn_params(ks[5], e)
    if stride != 1 or cin != e:
        blk["ws"] = he(ks[6], (cin, e), cin)
        blk["ss"], blk["bs"] = _fold_bn_params(ks[7], e)
    return blk


def init_resnet_params(key, num_blocks=(2, 1, 1, 1), num_classes=10):
    k_stem, k_bn, k_fc, k_fcb, k_blocks = jax.random.split(key, 5)
    p = {}
    p["stem_w"] = (jax.random.normal(k_stem, (3, 3, 3, 64), jnp.float32)
                   * (2.0 / 27) ** 0.5).astype(jnp.bfloat16)
    p["stem_s"], p["stem_b"] = _fold_bn_params(k_bn, 64)

    layers = []
    in_planes = 64
    bkeys = jax.random.split(k_blocks, sum(num_blocks))
    bi = 0
    for li, (planes, nb) in enumerate(zip((64, 128, 256, 512), num_blocks)):
        blocks = []
        for j in range(nb):
            stride = (1 if li == 0 else 2) if j == 0 else 1
            blocks.append(_init_block(bkeys[bi], in_planes, planes, stride))
            in_planes = planes * 4
            bi += 1
        layers.append(blocks)
    p["layers"] = layers

    p["fc_w"] = (jax.random.normal(k_fc, (512 * 4, num_classes), jnp.float32)
                 * (1.0 / (512 * 4)) ** 0.5).astype(jnp.bfloat16)
    p["fc_b"] = 0.01 * jax.random.normal(k_fcb, (1, num_classes), jnp.float32)
    return p


def resnet_forward(x_nchw, params):
    x = jnp.transpose(x_nchw, (0, 2, 3, 1))              # NHWC f32
    n, h, w, _ = x.shape

    # stem: 3x3 conv (3 channels, tiny 27-col im2col) + bn + relu
    patches = _im2col_3x3(x)
    hid = matmul_bn(patches, params["stem_w"].reshape(27, 64),
                    params["stem_s"], params["stem_b"], relu=True)
    hid = hid.reshape(n, h, w, 64)

    # residual stages (each block = one fused Pallas kernel)
    for blocks in params["layers"]:
        for blk in blocks:
            hid = bottleneck_block(hid, blk)

    n2, hh, wh, c = hid.shape
    assert hh == 4 and wh == 4, "avg_pool2d(4) head assumes 32x32 inputs"
    return avgpool_linear(hid.reshape(n2, hh * wh, c),
                          params["fc_w"], params["fc_b"])


# ----------------------------------------------------------------------------
# Pure-JAX reference (im2col + jnp.dot only) with the identical
# bf16-operand / f32-accumulate policy as the Pallas kernels.
# ----------------------------------------------------------------------------
def resnet_reference(x_nchw, params):
    f32, bf16 = jnp.float32, jnp.bfloat16

    def mm(a2d, w):
        return jnp.dot(a2d.astype(bf16), w.astype(bf16),
                       preferred_element_type=f32)

    def conv1x1(a, w, stride=1):
        if stride != 1:
            a = a[:, ::stride, ::stride, :]
        n, h, w_, c = a.shape
        return mm(a.reshape(n * h * w_, c), w).reshape(n, h, w_, w.shape[1])

    def conv3x3(a, w_hwio, stride):
        n, h, w_, c = a.shape
        o = w_hwio.shape[-1]
        ho, wo = h // stride, w_ // stride
        xp = jnp.pad(a, ((0, 0), (1, 1), (1, 1), (0, 0)))
        cols = [xp[:, ki:ki + stride * (ho - 1) + 1:stride,
                   kj:kj + stride * (wo - 1) + 1:stride, :]
                for ki in range(3) for kj in range(3)]
        patches = jnp.concatenate(cols, axis=-1).reshape(n * ho * wo, 9 * c)
        return mm(patches, w_hwio.reshape(9 * c, o)).reshape(n, ho, wo, o)

    x = jnp.transpose(x_nchw, (0, 2, 3, 1))
    n, h, w, _ = x.shape
    hid = mm(_im2col_3x3(x), params["stem_w"].reshape(27, 64))
    hid = jax.nn.relu(hid * params["stem_s"] + params["stem_b"]).astype(bf16)
    hid = hid.reshape(n, h, w, 64)

    for blocks in params["layers"]:
        for blk in blocks:
            s = blk["stride"]
            t = conv1x1(hid, blk["w1"])
            t = jax.nn.relu(t * blk["s1"] + blk["b1"]).astype(bf16)
            t = conv3x3(t, blk["w2"], s)
            t = jax.nn.relu(t * blk["s2"] + blk["b2"]).astype(bf16)
            t = conv1x1(t, blk["w3"])
            t = t * blk["s3"] + blk["b3"]
            if "ws" in blk:
                sc = conv1x1(hid, blk["ws"], stride=s)
                sc = sc * blk["ss"] + blk["bs"]
            else:
                sc = hid[:, ::s, ::s, :].astype(f32)
            hid = jax.nn.relu(t + sc).astype(bf16)

    pooled = jnp.mean(hid.astype(f32), axis=(1, 2))
    return mm(pooled, params["fc_w"]) + params["fc_b"]


# ----------------------------------------------------------------------------
if __name__ == "__main__":
    key = jax.random.PRNGKey(0)
    k_x, k_p = jax.random.split(key)

    # CIFAR-style ResNet with Bottleneck blocks (expansion 4), num_blocks=(2,1,1,1)
    x = jax.random.normal(k_x, (2, 3, 32, 32), jnp.float32)      # NCHW
    params = init_resnet_params(k_p, num_blocks=(2, 1, 1, 1), num_classes=10)

    out = jax.block_until_ready(resnet_forward(x, params))
    ref = jax.block_until_ready(resnet_reference(x, params))

    assert out.shape == (2, 10), out.shape
    max_err = float(jnp.max(jnp.abs(out - ref)))
    assert jnp.allclose(out, ref, rtol=2e-2, atol=2e-2), max_err

    print("KERNEL_OK")
</pallas_src>

<mosaic_0001>
module attributes {stable_mosaic.version = 11 : i64} {
  func.func @_mm_bn_kernel(%arg0: i32, %arg1: memref<512x32xbf16, #tpu.memory_space<vmem>>, %arg2: memref<32x64xbf16, #tpu.memory_space<vmem>>, %arg3: memref<1x64xf32, #tpu.memory_space<vmem>>, %arg4: memref<1x64xf32, #tpu.memory_space<vmem>>, %arg5: memref<512x64xbf16, #tpu.memory_space<vmem>>) attributes {dimension_semantics = [#tpu.dimension_semantics<parallel>], iteration_bounds = array<i64: 4>, scalar_prefetch = 0 : i64, scratch_operands = 0 : i64, tpu.core_type = #tpu.core_type<tc>, window_params = [{transform_indices = @transform_0, window_bounds = array<i64: 512, 32>}, {pipeline_mode = #tpu.pipeline_mode<synchronous>, transform_indices = @transform_1, window_bounds = array<i64: 32, 64>}, {pipeline_mode = #tpu.pipeline_mode<synchronous>, transform_indices = @transform_2, window_bounds = array<i64: 1, 64>}, {pipeline_mode = #tpu.pipeline_mode<synchronous>, transform_indices = @transform_3, window_bounds = array<i64: 1, 64>}, {transform_indices = @transform_4, window_bounds = array<i64: 512, 64>}]} {
    %c0 = arith.constant 0 : index
    %c0_0 = arith.constant 0 : index
    %0 = vector.load %arg1[%c0, %c0_0] : memref<512x32xbf16, #tpu.memory_space<vmem>>, vector<512x32xbf16>
    %c0_1 = arith.constant 0 : index
    %c0_2 = arith.constant 0 : index
    %1 = vector.load %arg2[%c0_1, %c0_2] : memref<32x64xbf16, #tpu.memory_space<vmem>>, vector<32x64xbf16>
    %cst = arith.constant dense<0.000000e+00> : vector<512x64xf32>
    %2 = tpu.matmul %0, %1, %cst {dimension_numbers = #tpu.dot_dimension_numbers<[1], [0], [0], [1], [0, 0, 1, 1], [], []>} : vector<512x32xbf16>, vector<32x64xbf16>, vector<512x64xf32> -> vector<512x64xf32>
    %c0_3 = arith.constant 0 : index
    %c0_4 = arith.constant 0 : index
    %3 = vector.load %arg3[%c0_3, %c0_4] : memref<1x64xf32, #tpu.memory_space<vmem>>, vector<1x64xf32>
    %4 = vector.broadcast %3 : vector<1x64xf32> to vector<512x64xf32>
    %5 = arith.mulf %2, %4 : vector<512x64xf32>
    %c0_5 = arith.constant 0 : index
    %c0_6 = arith.constant 0 : index
    %6 = vector.load %arg4[%c0_5, %c0_6] : memref<1x64xf32, #tpu.memory_space<vmem>>, vector<1x64xf32>
    %7 = vector.broadcast %6 : vector<1x64xf32> to vector<512x64xf32>
    %8 = arith.addf %5, %7 : vector<512x64xf32>
    %cst_7 = arith.constant 0.000000e+00 : f32
    %9 = vector.broadcast %cst_7 : f32 to vector<512x64xf32>
    %10 = arith.maximumf %8, %9 : vector<512x64xf32>
    %11 = arith.truncf %10 : vector<512x64xf32> to vector<512x64xbf16>
    %c0_8 = arith.constant 0 : index
    %c0_9 = arith.constant 0 : index
    %12 = vector.load %arg5[%c0_8, %c0_9] : memref<512x64xbf16, #tpu.memory_space<vmem>>, vector<512x64xbf16>
    tpu.vector_store %arg5[%c0_8, %c0_9], %11 {strides = array<i32>} : memref<512x64xbf16, #tpu.memory_space<vmem>>, vector<512x64xbf16>,
    return
  }
  func.func @transform_0(%arg0: i32) -> (i32, i32) {
    %c0_i32 = arith.constant 0 : i32
    %c0_i32_0 = arith.constant 0 : i32
    return %arg0, %c0_i32 : i32, i32
  }
  func.func @transform_1(%arg0: i32) -> (i32, i32) {
    %c0_i32 = arith.constant 0 : i32
    %c0_i32_0 = arith.constant 0 : i32
    %c0_i32_1 = arith.constant 0 : i32
    return %c0_i32, %c0_i32_0 : i32, i32
  }
  func.func @transform_2(%arg0: i32) -> (i32, i32) {
    %c0_i32 = arith.constant 0 : i32
    %c0_i32_0 = arith.constant 0 : i32
    %c0_i32_1 = arith.constant 0 : i32
    return %c0_i32, %c0_i32_0 : i32, i32
  }
  func.func @transform_3(%arg0: i32) -> (i32, i32) {
    %c0_i32 = arith.constant 0 : i32
    %c0_i32_0 = arith.constant 0 : i32
    %c0_i32_1 = arith.constant 0 : i32
    return %c0_i32, %c0_i32_0 : i32, i32
  }
  func.func @transform_4(%arg0: i32) -> (i32, i32) {
    %c0_i32 = arith.constant 0 : i32
    %c0_i32_0 = arith.constant 0 : i32
    return %arg0, %c0_i32 : i32, i32
  }
}

</mosaic_0001>

<bundles_post_ra>
// kernel: tpu_custom_call.1
= control target key start
LH: loop header
LB: loop body
LE: loop exit
PB: predicated region body
PF: predicated region fallthrough
CT: control target
= control target key end

     0   :  { %s1799_s15 = smov 0   ;;  %s2163_s0 = inlined_call_operand.vmem [shape: bf16[2048,32], index: 0, kind: input, shape index: {}]   ;;  %s2164_s1 = inlined_call_operand.vmem [shape: bf16[32,64], index: 1, kind: input, shape index: {}]   ;;  %s2165_s2 = inlined_call_operand.vmem [shape: f32[1,64], index: 2, kind: input, shape index: {}]   ;;  %s2166_s3 = inlined_call_operand.vmem [shape: f32[1,64], index: 3, kind: input, shape index: {}]   ;;  %s2167_s4 = inlined_call_operand.vmem [shape: bf16[2048,64], index: 4, kind: output, shape index: {}]  }
   0x1 LB: > { %s1411_s16 = sadd.s32 4294967295, %s1772_s15   ;;  %p1415_p0 = scmp.ge.s32.totalorder %s1772_s15, 1  ;;  %s1772_s15 = sphi %s1799_s15, %s14_s15  }
   0x2   : > { %p163_p1 = scmp.lt.s32.totalorder %s1772_s15, 5 }
   0x4   : > { %p164_p2 = pnand %p1415_p0, %p163_p1 }
   0x5   : > { %s1416_s19 = sshll.u32 (!%p164_p2), %s1411_s16, 6 }
   0x6   : > { %167 = sbr.rel (%p164_p2) target bundleno = 285 (0x11d), region = 36  ;;  %p190_p3 = scmp.lt.s32.totalorder (!%p164_p2), %s1416_s19, 255 }
   0xb   : > { %v1732_v0 = vld [vmem:[%s2164_s1 + $0x8] sm:$0xff]   ;;  %v1733_v1 = vld [vmem:[%s2164_s1] sm:$0xff]   ;;  %s2169_s19 = smov (!%p190_p3, %s1416_s19), 255  ;;  %vm442_vm0 = vcmask 261120   ;;  %vm1290_vm1 = vcmask 519168  }
   0xc   : > { %1652 = vmatprep.subr.bf16.mxu0 %v1732_v0  ;;  %1720 = vmatprep.subr.bf16.mxu1 %v1732_v0  ;;  %s1417_s22 = sshll.u32 %s2169_s19, 2  ;;  %v1890_v34 = vld [vmem:[%s2165_s2] ss:$0 sm:$0xff] }
   0xd   : > { %1653 = vmatpush3.bf16.msra.mxu0 %v1732_v0  ;;  %1722 = vmatpush3.bf16.msra.mxu1 %v1732_v0  ;;  %s1821_s25 = scalar_lea.vmem %s2163_s0, %s1417_s22  ;;  %v1895_v36 = vld [vmem:[%s2166_s3] ss:$0 sm:$0xff]  ;;  %s1910_s6 = scalar_lea.vmem %s2167_s4, %s1417_s22 }
   0xe   : > { %1654 = vmatprep.subr.bf16.mxu0 %v1733_v1  ;;  %1721 = vmatprep.subr.bf16.mxu1 %v1733_v1  ;;  %v1734_v2 = vld [vmem:[%s1821_s25] sm:$0xff]   ;;  %v1736_v4 = vld [vmem:[%s1821_s25 + $0x8] sm:$0xff]   ;;  %v1738_v6 = vld [vmem:[%s1821_s25 + $0x10] sm:$0xff]  }
   0xf   : > { %v1735_v3 = vld [vmem:[%s1821_s25 + $0x80] sm:$0xff]   ;;  %1656 = vmatprep.mubr.msk.bf16.mxu0 %vm442_vm0, %v1734_v2  ;;  %v1737_v5 = vld [vmem:[%s1821_s25 + $0x88] sm:$0xff]   ;;  %v1739_v7 = vld [vmem:[%s1821_s25 + $0x90] sm:$0xff]  }
  0x10   : > { %1688 = vmatprep.mubr.msk.bf16.mxu1 %vm442_vm0, %v1735_v3  ;;  %v1740_v8 = vld [vmem:[%s1821_s25 + $0x18] sm:$0xff]   ;;  %v1742_v10 = vld [vmem:[%s1821_s25 + $0x20] sm:$0xff]   ;;  %v1744_v12 = vld [vmem:[%s1821_s25 + $0x28] sm:$0xff]  }
  0x11   : > { %1655 = vmatpush3.bf16.msra.mxu0 %v1733_v1  ;;  %1723 = vmatpush3.bf16.msra.mxu1 %v1733_v1  ;;  %v1741_v9 = vld [vmem:[%s1821_s25 + $0x98] sm:$0xff]   ;;  %v1743_v11 = vld [vmem:[%s1821_s25 + $0xa0] sm:$0xff]   ;;  %v1745_v13 = vld [vmem:[%s1821_s25 + $0xa8] sm:$0xff]  }
  0x12   : > { %v1746_v14 = vld [vmem:[%s1821_s25 + $0x30] sm:$0xff]   ;;  %v1748_v16 = vld [vmem:[%s1821_s25 + $0x38] sm:$0xff]   ;;  %v1750_v18 = vld [vmem:[%s1821_s25 + $0x40] sm:$0xff]  }
  0x13   : > { %v1747_v15 = vld [vmem:[%s1821_s25 + $0xb0] sm:$0xff]   ;;  %v1749_v17 = vld [vmem:[%s1821_s25 + $0xb8] sm:$0xff]   ;;  %v1751_v19 = vld [vmem:[%s1821_s25 + $0xc0] sm:$0xff]  }
  0x14   : > { %1657 = vmatmul.mubr.msk.bf16.vlgmr.msra.gmra.mxu0 %vm442_vm0, %v1736_v4  ;;  %1689 = vmatmul.mubr.msk.bf16.vlgmr.msra.gmra.mxu1 %vm442_vm0, %v1737_v5  ;;  %v1752_v20 = vld [vmem:[%s1821_s25 + $0x48] sm:$0xff]   ;;  %v1754_v22 = vld [vmem:[%s1821_s25 + $0x50] sm:$0xff]   ;;  %v1756_v24 = vld [vmem:[%s1821_s25 + $0x58] sm:$0xff]  }
  0x15   : > { %1660 = vmatprep.mubr.msk.bf16.mxu0 %vm442_vm0, %v1738_v6  ;;  %1692 = vmatprep.mubr.msk.bf16.mxu1 %vm442_vm0, %v1739_v7  ;;  %v1753_v21 = vld [vmem:[%s1821_s25 + $0xc8] sm:$0xff]   ;;  %v1755_v23 = vld [vmem:[%s1821_s25 + $0xd0] sm:$0xff]   ;;  %v1757_v25 = vld [vmem:[%s1821_s25 + $0xd8] sm:$0xff]  }
  0x16   : > { %v1758_v26 = vld [vmem:[%s1821_s25 + $0x60] sm:$0xff]   ;;  %v1760_v28 = vld [vmem:[%s1821_s25 + $0x68] sm:$0xff]   ;;  %v1762_v30 = vld [vmem:[%s1821_s25 + $0x70] sm:$0xff]  }
  0x17   : > { %v1759_v27 = vld [vmem:[%s1821_s25 + $0xe0] sm:$0xff]   ;;  %v1761_v29 = vld [vmem:[%s1821_s25 + $0xe8] sm:$0xff]   ;;  %v1763_v31 = vld [vmem:[%s1821_s25 + $0xf0] sm:$0xff]  }
  0x18   : > { %v1764_v32 = vld [vmem:[%s1821_s25 + $0x78] sm:$0xff]  }
  0x19   : > { %v1765_v33 = vld [vmem:[%s1821_s25 + $0xf8] sm:$0xff]  }
  0x1c   : > { %1661 = vmatmul.mubr.msk.bf16.gmra.mxu0 %vm442_vm0, %v1740_v8  ;;  %1693 = vmatmul.mubr.msk.bf16.gmra.mxu1 %vm442_vm0, %v1741_v9 }
  0x1d   : > { %1664 = vmatprep.mubr.msk.bf16.mxu0 %vm442_vm0, %v1742_v10  ;;  %1696 = vmatprep.mubr.msk.bf16.mxu1 %vm442_vm0, %v1743_v11 }
  0x24   : > { %1665 = vmatmul.mubr.msk.bf16.gmra.mxu0 %vm442_vm0, %v1744_v12  ;;  %1697 = vmatmul.mubr.msk.bf16.gmra.mxu1 %vm442_vm0, %v1745_v13 }
  0x25   : > { %1668 = vmatprep.mubr.msk.bf16.mxu0 %vm442_vm0, %v1746_v14  ;;  %1700 = vmatprep.mubr.msk.bf16.mxu1 %vm442_vm0, %v1747_v15 }
  0x2c   : > { %1669 = vmatmul.mubr.msk.bf16.gmra.mxu0 %vm442_vm0, %v1748_v16  ;;  %1701 = vmatmul.mubr.msk.bf16.gmra.mxu1 %vm442_vm0, %v1749_v17 }
  0x2d   : > { %1672 = vmatprep.mubr.msk.bf16.mxu0 %vm442_vm0, %v1750_v18  ;;  %1704 = vmatprep.mubr.msk.bf16.mxu1 %vm442_vm0, %v1751_v19 }
  0x34   : > { %1673 = vmatmul.mubr.msk.bf16.gmra.mxu0 %vm442_vm0, %v1752_v20  ;;  %1705 = vmatmul.mubr.msk.bf16.gmra.mxu1 %vm442_vm0, %v1753_v21 }
  0x35   : > { %1676 = vmatprep.mubr.msk.bf16.mxu0 %vm442_vm0, %v1754_v22  ;;  %1708 = vmatprep.mubr.msk.bf16.mxu1 %vm442_vm0, %v1755_v23 }
  0x3c   : > { %1677 = vmatmul.mubr.msk.bf16.gmra.mxu0 %vm442_vm0, %v1756_v24  ;;  %1709 = vmatmul.mubr.msk.bf16.gmra.mxu1 %vm442_vm0, %v1757_v25 }
  0x3d   : > { %1680 = vmatprep.mubr.msk.bf16.mxu0 %vm442_vm0, %v1758_v26  ;;  %1712 = vmatprep.mubr.msk.bf16.mxu1 %vm442_vm0, %v1759_v27 }
  0x44   : > { %1681 = vmatmul.mubr.msk.bf16.gmra.mxu0 %vm442_vm0, %v1760_v28  ;;  %1713 = vmatmul.mubr.msk.bf16.gmra.mxu1 %vm442_vm0, %v1761_v29 }
  0x45   : > { %1684 = vmatprep.mubr.msk.bf16.mxu0 %vm442_vm0, %v1762_v30  ;;  %1716 = vmatprep.mubr.msk.bf16.mxu1 %vm442_vm0, %v1763_v31 }
  0x4c   : > { %1685 = vmatmul.mubr.msk.bf16.gmra.mxu0 %vm442_vm0, %v1764_v32  ;;  %1717 = vmatmul.mubr.msk.bf16.gmra.mxu1 %vm442_vm0, %v1765_v33 }
  0xd4   : > { %v1658_v35 = vpop.f32.mrf.mxu0  ;;  %v1690_v38 = vpop.f32.mrf.mxu1 }
  0xd5   : > { %v837_v37 = vmul.f32 %v1658_v35, %v1890_v34  ;;  %v869_v39 = vmul.f32 %v1690_v38, %v1890_v34 }
  0xd6   : > { %v573_v40 = vpop.f32.mrf.mxu0  ;;  %v701_v43 = vpop.f32.mrf.mxu1 }
  0xd7   : > { %v908_v41 = vadd.f32 %v1895_v36, %v837_v37  ;;  %v835_v42 = vmul.f32 %v1890_v34, %v573_v40  ;;  %v940_v44 = vadd.f32 %v1895_v36, %v869_v39  ;;  %v867_v45 = vmul.f32 %v1890_v34, %v701_v43 }
  0xd8   : > { %v1659_v46 = vpop.f32.mrf.mxu0  ;;  %v1691_v50 = vpop.f32.mrf.mxu1 }
  0xd9   : > { %v972_v47 = vmax.f32 %v908_v41, 0.0  ;;  %v906_v48 = vadd.f32 %v1895_v36, %v835_v42  ;;  %v838_v49 = vmul.f32 %v1659_v46, %v1890_v34  ;;  %v1004_v51 = vmax.f32 %v940_v44, 0.0 }
  0xda   : > { %v938_v52 = vadd.f32 %v1895_v36, %v867_v45  ;;  %v870_v53 = vmul.f32 %v1691_v50, %v1890_v34  ;;  %v576_v54 = vpop.f32.mrf.mxu0  ;;  %v704_v59 = vpop.f32.mrf.mxu1 }
  0xdb   : > { %v1556_v55 = vpack.c.bf16 %v972_v47, %v972_v47  ;;  %v970_v56 = vmax.f32 %v906_v48, 0.0  ;;  %v909_v57 = vadd.f32 %v1895_v36, %v838_v49  ;;  %v836_v58 = vmul.f32 %v1890_v34, %v576_v54 }
  0xdc   : > { %v1588_v60 = vpack.c.bf16 %v1004_v51, %v1004_v51  ;;  %v1002_v61 = vmax.f32 %v938_v52, 0.0  ;;  %v941_v62 = vadd.f32 %v1895_v36, %v870_v53  ;;  %v868_v63 = vmul.f32 %v1890_v34, %v704_v59  ;;  %v1662_v0 = vpop.f32.mrf.mxu0  ;;  %v1694_v5 = vpop.f32.mrf.mxu1 }
  0xdd   : > { %1293 = vst.msk [vmem:[%s1910_s6 + $0x8] sm:$0xf] %vm1290_vm1, %v1556_v55  ;;  %v1554_v1 = vpack.c.bf16 %v970_v56, %v970_v56  ;;  %v973_v2 = vmax.f32 %v909_v57, 0.0  ;;  %v907_v3 = vadd.f32 %v1895_v36, %v836_v58  ;;  %v841_v4 = vmul.f32 %v1662_v0, %v1890_v34 }
  0xde   : > { %1325 = vst.msk [vmem:[%s1910_s6 + $0x88] sm:$0xf] %vm1290_vm1, %v1588_v60  ;;  %v1586_v6 = vpack.c.bf16 %v1002_v61, %v1002_v61  ;;  %v1005_v7 = vmax.f32 %v941_v62, 0.0  ;;  %v939_v8 = vadd.f32 %v1895_v36, %v868_v63  ;;  %v873_v9 = vmul.f32 %v1694_v5, %v1890_v34  ;;  %v589_v10 = vpop.f32.mrf.mxu0  ;;  %v717_v15 = vpop.f32.mrf.mxu1 }
  0xdf   : > { %1291 = vst.msk [vmem:[%s1910_s6] sm:$0xf] %vm1290_vm1, %v1554_v1  ;;  %v1557_v11 = vpack.c.bf16 %v973_v2, %v973_v2  ;;  %v971_v12 = vmax.f32 %v907_v3, 0.0  ;;  %v912_v13 = vadd.f32 %v1895_v36, %v841_v4  ;;  %v839_v14 = vmul.f32 %v1890_v34, %v589_v10 }
  0xe0   : > { %1323 = vst.msk [vmem:[%s1910_s6 + $0x80] sm:$0xf] %vm1290_vm1, %v1586_v6  ;;  %v1589_v16 = vpack.c.bf16 %v1005_v7, %v1005_v7  ;;  %v1003_v17 = vmax.f32 %v939_v8, 0.0  ;;  %v944_v18 = vadd.f32 %v1895_v36, %v873_v9  ;;  %v871_v19 = vmul.f32 %v1890_v34, %v717_v15  ;;  %v1663_v20 = vpop.f32.mrf.mxu0  ;;  %v1695_v25 = vpop.f32.mrf.mxu1 }
  0xe1   : > { %1294 = vst.msk [vmem:[%s1910_s6 + $0xc] sm:$0xf] %vm1290_vm1, %v1557_v11  ;;  %v1555_v21 = vpack.c.bf16 %v971_v12, %v971_v12  ;;  %v976_v22 = vmax.f32 %v912_v13, 0.0  ;;  %v910_v23 = vadd.f32 %v1895_v36, %v839_v14  ;;  %v842_v24 = vmul.f32 %v1663_v20, %v1890_v34 }
  0xe2   : > { %1326 = vst.msk [vmem:[%s1910_s6 + $0x8c] sm:$0xf] %vm1290_vm1, %v1589_v16  ;;  %v1587_v26 = vpack.c.bf16 %v1003_v17, %v1003_v17  ;;  %v1008_v27 = vmax.f32 %v944_v18, 0.0  ;;  %v942_v28 = vadd.f32 %v1895_v36, %v871_v19  ;;  %v874_v29 = vmul.f32 %v1695_v25, %v1890_v34  ;;  %v592_v30 = vpop.f32.mrf.mxu0  ;;  %v720_v37 = vpop.f32.mrf.mxu1 }
  0xe3   : > { %1292 = vst.msk [vmem:[%s1910_s6 + $0x4] sm:$0xf] %vm1290_vm1, %v1555_v21  ;;  %v1560_v31 = vpack.c.bf16 %v976_v22, %v976_v22  ;;  %v974_v32 = vmax.f32 %v910_v23, 0.0  ;;  %v913_v33 = vadd.f32 %v1895_v36, %v842_v24  ;;  %v840_v35 = vmul.f32 %v1890_v34, %v592_v30 }
  0xe4   : > { %1324 = vst.msk [vmem:[%s1910_s6 + $0x84] sm:$0xf] %vm1290_vm1, %v1587_v26  ;;  %v1592_v38 = vpack.c.bf16 %v1008_v27, %v1008_v27  ;;  %v1006_v39 = vmax.f32 %v942_v28, 0.0  ;;  %v945_v40 = vadd.f32 %v1895_v36, %v874_v29  ;;  %v872_v41 = vmul.f32 %v1890_v34, %v720_v37  ;;  %v1666_v42 = vpop.f32.mrf.mxu0  ;;  %v1698_v47 = vpop.f32.mrf.mxu1 }
  0xe5   : > { %1297 = vst.msk [vmem:[%s1910_s6 + $0x18] sm:$0xf] %vm1290_vm1, %v1560_v31  ;;  %v1558_v43 = vpack.c.bf16 %v974_v32, %v974_v32  ;;  %v977_v44 = vmax.f32 %v913_v33, 0.0  ;;  %v911_v45 = vadd.f32 %v1895_v36, %v840_v35  ;;  %v845_v46 = vmul.f32 %v1666_v42, %v1890_v34 }
  0xe6   : > { %1329 = vst.msk [vmem:[%s1910_s6 + $0x98] sm:$0xf] %vm1290_vm1, %v1592_v38  ;;  %v1590_v48 = vpack.c.bf16 %v1006_v39, %v1006_v39  ;;  %v1009_v49 = vmax.f32 %v945_v40, 0.0  ;;  %v943_v50 = vadd.f32 %v1895_v36, %v872_v41  ;;  %v877_v51 = vmul.f32 %v1698_v47, %v1890_v34  ;;  %v605_v52 = vpop.f32.mrf.mxu0  ;;  %v733_v57 = vpop.f32.mrf.mxu1 }
  0xe7   : > { %1295 = vst.msk [vmem:[%s1910_s6 + $0x10] sm:$0xf] %vm1290_vm1, %v1558_v43  ;;  %v1561_v53 = vpack.c.bf16 %v977_v44, %v977_v44  ;;  %v975_v54 = vmax.f32 %v911_v45, 0.0  ;;  %v916_v55 = vadd.f32 %v1895_v36, %v845_v46  ;;  %v843_v56 = vmul.f32 %v1890_v34, %v605_v52 }
  0xe8   : > { %1327 = vst.msk [vmem:[%s1910_s6 + $0x90] sm:$0xf] %vm1290_vm1, %v1590_v48  ;;  %v1593_v58 = vpack.c.bf16 %v1009_v49, %v1009_v49  ;;  %v1007_v59 = vmax.f32 %v943_v50, 0.0  ;;  %v948_v60 = vadd.f32 %v1895_v36, %v877_v51  ;;  %v875_v61 = vmul.f32 %v1890_v34, %v733_v57  ;;  %v1667_v62 = vpop.f32.mrf.mxu0  ;;  %v1699_v3 = vpop.f32.mrf.mxu1 }
  0xe9   : > { %1298 = vst.msk [vmem:[%s1910_s6 + $0x1c] sm:$0xf] %vm1290_vm1, %v1561_v53  ;;  %v1559_v63 = vpack.c.bf16 %v975_v54, %v975_v54  ;;  %v980_v0 = vmax.f32 %v916_v55, 0.0  ;;  %v914_v1 = vadd.f32 %v1895_v36, %v843_v56  ;;  %v846_v2 = vmul.f32 %v1667_v62, %v1890_v34 }
  0xea   : > { %1330 = vst.msk [vmem:[%s1910_s6 + $0x9c] sm:$0xf] %vm1290_vm1, %v1593_v58  ;;  %v1591_v4 = vpack.c.bf16 %v1007_v59, %v1007_v59  ;;  %v1012_v5 = vmax.f32 %v948_v60, 0.0  ;;  %v946_v6 = vadd.f32 %v1895_v36, %v875_v61  ;;  %v878_v7 = vmul.f32 %v1699_v3, %v1890_v34  ;;  %v608_v8 = vpop.f32.mrf.mxu0  ;;  %v736_v13 = vpop.f32.mrf.mxu1 }
  0xeb   : > { %1296 = vst.msk [vmem:[%s1910_s6 + $0x14] sm:$0xf] %vm1290_vm1, %v1559_v63  ;;  %v1564_v9 = vpack.c.bf16 %v980_v0, %v980_v0  ;;  %v978_v10 = vmax.f32 %v914_v1, 0.0  ;;  %v917_v11 = vadd.f32 %v1895_v36, %v846_v2  ;;  %v844_v12 = vmul.f32 %v1890_v34, %v608_v8 }
  0xec   : > { %1328 = vst.msk [vmem:[%s1910_s6 + $0x94] sm:$0xf] %vm1290_vm1, %v1591_v4  ;;  %v1596_v14 = vpack.c.bf16 %v1012_v5, %v1012_v5  ;;  %v1010_v15 = vmax.f32 %v946_v6, 0.0  ;;  %v949_v16 = vadd.f32 %v1895_v36, %v878_v7  ;;  %v876_v17 = vmul.f32 %v1890_v34, %v736_v13  ;;  %v1670_v18 = vpop.f32.mrf.mxu0  ;;  %v1702_v23 = vpop.f32.mrf.mxu1 }
  0xed   : > { %1301 = vst.msk [vmem:[%s1910_s6 + $0x28] sm:$0xf] %vm1290_vm1, %v1564_v9  ;;  %v1562_v19 = vpack.c.bf16 %v978_v10, %v978_v10  ;;  %v981_v20 = vmax.f32 %v917_v11, 0.0  ;;  %v915_v21 = vadd.f32 %v1895_v36, %v844_v12  ;;  %v849_v22 = vmul.f32 %v1670_v18, %v1890_v34 }
  0xee   : > { %1333 = vst.msk [vmem:[%s1910_s6 + $0xa8] sm:$0xf] %vm1290_vm1, %v1596_v14  ;;  %v1594_v24 = vpack.c.bf16 %v1010_v15, %v1010_v15  ;;  %v1013_v25 = vmax.f32 %v949_v16, 0.0  ;;  %v947_v26 = vadd.f32 %v1895_v36, %v876_v17  ;;  %v881_v27 = vmul.f32 %v1702_v23, %v1890_v34  ;;  %v621_v28 = vpop.f32.mrf.mxu0  ;;  %v749_v33 = vpop.f32.mrf.mxu1 }
  0xef   : > { %1299 = vst.msk [vmem:[%s1910_s6 + $0x20] sm:$0xf] %vm1290_vm1, %v1562_v19  ;;  %v1565_v29 = vpack.c.bf16 %v981_v20, %v981_v20  ;;  %v979_v30 = vmax.f32 %v915_v21, 0.0  ;;  %v920_v31 = vadd.f32 %v1895_v36, %v849_v22  ;;  %v847_v32 = vmul.f32 %v1890_v34, %v621_v28 }
  0xf0   : > { %1331 = vst.msk [vmem:[%s1910_s6 + $0xa0] sm:$0xf] %vm1290_vm1, %v1594_v24  ;;  %v1597_v35 = vpack.c.bf16 %v1013_v25, %v1013_v25  ;;  %v1011_v37 = vmax.f32 %v947_v26, 0.0  ;;  %v952_v38 = vadd.f32 %v1895_v36, %v881_v27  ;;  %v879_v39 = vmul.f32 %v1890_v34, %v749_v33  ;;  %v1671_v40 = vpop.f32.mrf.mxu0  ;;  %v1703_v45 = vpop.f32.mrf.mxu1 }
  0xf1   : > { %1302 = vst.msk [vmem:[%s1910_s6 + $0x2c] sm:$0xf] %vm1290_vm1, %v1565_v29  ;;  %v1563_v41 = vpack.c.bf16 %v979_v30, %v979_v30  ;;  %v984_v42 = vmax.f32 %v920_v31, 0.0  ;;  %v918_v43 = vadd.f32 %v1895_v36, %v847_v32  ;;  %v850_v44 = vmul.f32 %v1671_v40, %v1890_v34 }
  0xf2   : > { %1334 = vst.msk [vmem:[%s1910_s6 + $0xac] sm:$0xf] %vm1290_vm1, %v1597_v35  ;;  %v1595_v46 = vpack.c.bf16 %v1011_v37, %v1011_v37  ;;  %v1016_v47 = vmax.f32 %v952_v38, 0.0  ;;  %v950_v48 = vadd.f32 %v1895_v36, %v879_v39  ;;  %v882_v49 = vmul.f32 %v1703_v45, %v1890_v34  ;;  %v624_v50 = vpop.f32.mrf.mxu0  ;;  %v752_v55 = vpop.f32.mrf.mxu1 }
  0xf3   : > { %1300 = vst.msk [vmem:[%s1910_s6 + $0x24] sm:$0xf] %vm1290_vm1, %v1563_v41  ;;  %v1568_v51 = vpack.c.bf16 %v984_v42, %v984_v42  ;;  %v982_v52 = vmax.f32 %v918_v43, 0.0  ;;  %v921_v53 = vadd.f32 %v1895_v36, %v850_v44  ;;  %v848_v54 = vmul.f32 %v1890_v34, %v624_v50 }
  0xf4   : > { %1332 = vst.msk [vmem:[%s1910_s6 + $0xa4] sm:$0xf] %vm1290_vm1, %v1595_v46  ;;  %v1600_v56 = vpack.c.bf16 %v1016_v47, %v1016_v47  ;;  %v1014_v57 = vmax.f32 %v950_v48, 0.0  ;;  %v953_v58 = vadd.f32 %v1895_v36, %v882_v49  ;;  %v880_v59 = vmul.f32 %v1890_v34, %v752_v55  ;;  %v1674_v60 = vpop.f32.mrf.mxu0  ;;  %v1706_v1 = vpop.f32.mrf.mxu1 }
  0xf5   : > { %1305 = vst.msk [vmem:[%s1910_s6 + $0x38] sm:$0xf] %vm1290_vm1, %v1568_v51  ;;  %v1566_v61 = vpack.c.bf16 %v982_v52, %v982_v52  ;;  %v985_v62 = vmax.f32 %v921_v53, 0.0  ;;  %v919_v63 = vadd.f32 %v1895_v36, %v848_v54  ;;  %v853_v0 = vmul.f32 %v1674_v60, %v1890_v34 }
  0xf6   : > { %1337 = vst.msk [vmem:[%s1910_s6 + $0xb8] sm:$0xf] %vm1290_vm1, %v1600_v56  ;;  %v1598_v2 = vpack.c.bf16 %v1014_v57, %v1014_v57  ;;  %v1017_v3 = vmax.f32 %v953_v58, 0.0  ;;  %v951_v4 = vadd.f32 %v1895_v36, %v880_v59  ;;  %v885_v5 = vmul.f32 %v1706_v1, %v1890_v34  ;;  %v637_v6 = vpop.f32.mrf.mxu0  ;;  %v765_v11 = vpop.f32.mrf.mxu1 }
  0xf7   : > { %1303 = vst.msk [vmem:[%s1910_s6 + $0x30] sm:$0xf] %vm1290_vm1, %v1566_v61  ;;  %v1569_v7 = vpack.c.bf16 %v985_v62, %v985_v62  ;;  %v983_v8 = vmax.f32 %v919_v63, 0.0  ;;  %v924_v9 = vadd.f32 %v1895_v36, %v853_v0  ;;  %v851_v10 = vmul.f32 %v1890_v34, %v637_v6 }
  0xf8   : > { %1335 = vst.msk [vmem:[%s1910_s6 + $0xb0] sm:$0xf] %vm1290_vm1, %v1598_v2  ;;  %v1601_v12 = vpack.c.bf16 %v1017_v3, %v1017_v3  ;;  %v1015_v13 = vmax.f32 %v951_v4, 0.0  ;;  %v956_v14 = vadd.f32 %v1895_v36, %v885_v5  ;;  %v883_v15 = vmul.f32 %v1890_v34, %v765_v11  ;;  %v1675_v16 = vpop.f32.mrf.mxu0  ;;  %v1707_v21 = vpop.f32.mrf.mxu1 }
  0xf9   : > { %1306 = vst.msk [vmem:[%s1910_s6 + $0x3c] sm:$0xf] %vm1290_vm1, %v1569_v7  ;;  %v1567_v17 = vpack.c.bf16 %v983_v8, %v983_v8  ;;  %v988_v18 = vmax.f32 %v924_v9, 0.0  ;;  %v922_v19 = vadd.f32 %v1895_v36, %v851_v10  ;;  %v854_v20 = vmul.f32 %v1675_v16, %v1890_v34 }
  0xfa   : > { %1338 = vst.msk [vmem:[%s1910_s6 + $0xbc] sm:$0xf] %vm1290_vm1, %v1601_v12  ;;  %v1599_v22 = vpack.c.bf16 %v1015_v13, %v1015_v13  ;;  %v1020_v23 = vmax.f32 %v956_v14, 0.0  ;;  %v954_v24 = vadd.f32 %v1895_v36, %v883_v15  ;;  %v886_v25 = vmul.f32 %v1707_v21, %v1890_v34  ;;  %v640_v26 = vpop.f32.mrf.mxu0  ;;  %v768_v31 = vpop.f32.mrf.mxu1 }
  0xfb   : > { %1304 = vst.msk [vmem:[%s1910_s6 + $0x34] sm:$0xf] %vm1290_vm1, %v1567_v17  ;;  %v1572_v27 = vpack.c.bf16 %v988_v18, %v988_v18  ;;  %v986_v28 = vmax.f32 %v922_v19, 0.0  ;;  %v925_v29 = vadd.f32 %v1895_v36, %v854_v20  ;;  %v852_v30 = vmul.f32 %v1890_v34, %v640_v26 }
  0xfc   : > { %1336 = vst.msk [vmem:[%s1910_s6 + $0xb4] sm:$0xf] %vm1290_vm1, %v1599_v22  ;;  %v1604_v32 = vpack.c.bf16 %v1020_v23, %v1020_v23  ;;  %v1018_v33 = vmax.f32 %v954_v24, 0.0  ;;  %v957_v35 = vadd.f32 %v1895_v36, %v886_v25  ;;  %v884_v37 = vmul.f32 %v1890_v34, %v768_v31  ;;  %v1678_v38 = vpop.f32.mrf.mxu0  ;;  %v1710_v43 = vpop.f32.mrf.mxu1 }
  0xfd   : > { %1309 = vst.msk [vmem:[%s1910_s6 + $0x48] sm:$0xf] %vm1290_vm1, %v1572_v27  ;;  %v1570_v39 = vpack.c.bf16 %v986_v28, %v986_v28  ;;  %v989_v40 = vmax.f32 %v925_v29, 0.0  ;;  %v923_v41 = vadd.f32 %v1895_v36, %v852_v30  ;;  %v857_v42 = vmul.f32 %v1678_v38, %v1890_v34 }
  0xfe   : > { %1341 = vst.msk [vmem:[%s1910_s6 + $0xc8] sm:$0xf] %vm1290_vm1, %v1604_v32  ;;  %v1602_v44 = vpack.c.bf16 %v1018_v33, %v1018_v33  ;;  %v1021_v45 = vmax.f32 %v957_v35, 0.0  ;;  %v955_v46 = vadd.f32 %v1895_v36, %v884_v37  ;;  %v889_v47 = vmul.f32 %v1710_v43, %v1890_v34  ;;  %v653_v48 = vpop.f32.mrf.mxu0  ;;  %v781_v53 = vpop.f32.mrf.mxu1 }
  0xff   : > { %1307 = vst.msk [vmem:[%s1910_s6 + $0x40] sm:$0xf] %vm1290_vm1, %v1570_v39  ;;  %v1573_v49 = vpack.c.bf16 %v989_v40, %v989_v40  ;;  %v987_v50 = vmax.f32 %v923_v41, 0.0  ;;  %v928_v51 = vadd.f32 %v1895_v36, %v857_v42  ;;  %v855_v52 = vmul.f32 %v1890_v34, %v653_v48 }
 0x100   : > { %1339 = vst.msk [vmem:[%s1910_s6 + $0xc0] sm:$0xf] %vm1290_vm1, %v1602_v44  ;;  %v1605_v54 = vpack.c.bf16 %v1021_v45, %v1021_v45  ;;  %v1019_v55 = vmax.f32 %v955_v46, 0.0  ;;  %v960_v56 = vadd.f32 %v1895_v36, %v889_v47  ;;  %v887_v57 = vmul.f32 %v1890_v34, %v781_v53  ;;  %v1679_v58 = vpop.f32.mrf.mxu0  ;;  %v1711_v63 = vpop.f32.mrf.mxu1 }
 0x101   : > { %1310 = vst.msk [vmem:[%s1910_s6 + $0x4c] sm:$0xf] %vm1290_vm1, %v1573_v49  ;;  %v1571_v59 = vpack.c.bf16 %v987_v50, %v987_v50  ;;  %v992_v60 = vmax.f32 %v928_v51, 0.0  ;;  %v926_v61 = vadd.f32 %v1895_v36, %v855_v52  ;;  %v858_v62 = vmul.f32 %v1679_v58, %v1890_v34 }
 0x102   : > { %1342 = vst.msk [vmem:[%s1910_s6 + $0xcc] sm:$0xf] %vm1290_vm1, %v1605_v54  ;;  %v1603_v0 = vpack.c.bf16 %v1019_v55, %v1019_v55  ;;  %v1024_v1 = vmax.f32 %v960_v56, 0.0  ;;  %v958_v2 = vadd.f32 %v1895_v36, %v887_v57  ;;  %v890_v3 = vmul.f32 %v1711_v63, %v1890_v34  ;;  %v656_v4 = vpop.f32.mrf.mxu0  ;;  %v784_v9 = vpop.f32.mrf.mxu1 }
 0x103   : > { %1308 = vst.msk [vmem:[%s1910_s6 + $0x44] sm:$0xf] %vm1290_vm1, %v1571_v59  ;;  %v1576_v5 = vpack.c.bf16 %v992_v60, %v992_v60  ;;  %v990_v6 = vmax.f32 %v926_v61, 0.0  ;;  %v929_v7 = vadd.f32 %v1895_v36, %v858_v62  ;;  %v856_v8 = vmul.f32 %v1890_v34, %v656_v4 }
 0x104   : > { %1340 = vst.msk [vmem:[%s1910_s6 + $0xc4] sm:$0xf] %vm1290_vm1, %v1603_v0  ;;  %v1608_v10 = vpack.c.bf16 %v1024_v1, %v1024_v1  ;;  %v1022_v11 = vmax.f32 %v958_v2, 0.0  ;;  %v961_v12 = vadd.f32 %v1895_v36, %v890_v3  ;;  %v888_v13 = vmul.f32 %v1890_v34, %v784_v9  ;;  %v1682_v14 = vpop.f32.mrf.mxu0  ;;  %v1714_v19 = vpop.f32.mrf.mxu1 }
 0x105   : > { %1313 = vst.msk [vmem:[%s1910_s6 + $0x58] sm:$0xf] %vm1290_vm1, %v1576_v5  ;;  %v1574_v15 = vpack.c.bf16 %v990_v6, %v990_v6  ;;  %v993_v16 = vmax.f32 %v929_v7, 0.0  ;;  %v927_v17 = vadd.f32 %v1895_v36, %v856_v8  ;;  %v861_v18 = vmul.f32 %v1682_v14, %v1890_v34 }
 0x106   : > { %1345 = vst.msk [vmem:[%s1910_s6 + $0xd8] sm:$0xf] %vm1290_vm1, %v1608_v10  ;;  %v1606_v20 = vpack.c.bf16 %v1022_v11, %v1022_v11  ;;  %v1025_v21 = vmax.f32 %v961_v12, 0.0  ;;  %v959_v22 = vadd.f32 %v1895_v36, %v888_v13  ;;  %v893_v23 = vmul.f32 %v1714_v19, %v1890_v34  ;;  %v669_v24 = vpop.f32.mrf.mxu0  ;;  %v797_v29 = vpop.f32.mrf.mxu1 }
 0x107   : > { %1311 = vst.msk [vmem:[%s1910_s6 + $0x50] sm:$0xf] %vm1290_vm1, %v1574_v15  ;;  %v1577_v25 = vpack.c.bf16 %v993_v16, %v993_v16  ;;  %v991_v26 = vmax.f32 %v927_v17, 0.0  ;;  %v932_v27 = vadd.f32 %v1895_v36, %v861_v18  ;;  %v859_v28 = vmul.f32 %v1890_v34, %v669_v24 }
 0x108   : > { %1343 = vst.msk [vmem:[%s1910_s6 + $0xd0] sm:$0xf] %vm1290_vm1, %v1606_v20  ;;  %v1609_v30 = vpack.c.bf16 %v1025_v21, %v1025_v21  ;;  %v1023_v31 = vmax.f32 %v959_v22, 0.0  ;;  %v964_v32 = vadd.f32 %v1895_v36, %v893_v23  ;;  %v891_v33 = vmul.f32 %v1890_v34, %v797_v29  ;;  %v1683_v35 = vpop.f32.mrf.mxu0  ;;  %v1715_v41 = vpop.f32.mrf.mxu1 }
 0x109   : > { %1314 = vst.msk [vmem:[%s1910_s6 + $0x5c] sm:$0xf] %vm1290_vm1, %v1577_v25  ;;  %v1575_v37 = vpack.c.bf16 %v991_v26, %v991_v26  ;;  %v996_v38 = vmax.f32 %v932_v27, 0.0  ;;  %v930_v39 = vadd.f32 %v1895_v36, %v859_v28  ;;  %v862_v40 = vmul.f32 %v1683_v35, %v1890_v34 }
 0x10a   : > { %1346 = vst.msk [vmem:[%s1910_s6 + $0xdc] sm:$0xf] %vm1290_vm1, %v1609_v30  ;;  %v1607_v42 = vpack.c.bf16 %v1023_v31, %v1023_v31  ;;  %v1028_v43 = vmax.f32 %v964_v32, 0.0  ;;  %v962_v44 = vadd.f32 %v1895_v36, %v891_v33  ;;  %v894_v45 = vmul.f32 %v1715_v41, %v1890_v34  ;;  %v672_v46 = vpop.f32.mrf.mxu0  ;;  %v800_v51 = vpop.f32.mrf.mxu1 }
 0x10b   : > { %1312 = vst.msk [vmem:[%s1910_s6 + $0x54] sm:$0xf] %vm1290_vm1, %v1575_v37  ;;  %v1580_v47 = vpack.c.bf16 %v996_v38, %v996_v38  ;;  %v994_v48 = vmax.f32 %v930_v39, 0.0  ;;  %v933_v49 = vadd.f32 %v1895_v36, %v862_v40  ;;  %v860_v50 = vmul.f32 %v1890_v34, %v672_v46 }
 0x10c   : > { %1344 = vst.msk [vmem:[%s1910_s6 + $0xd4] sm:$0xf] %vm1290_vm1, %v1607_v42  ;;  %v1612_v52 = vpack.c.bf16 %v1028_v43, %v1028_v43  ;;  %v1026_v53 = vmax.f32 %v962_v44, 0.0  ;;  %v965_v54 = vadd.f32 %v1895_v36, %v894_v45  ;;  %v892_v55 = vmul.f32 %v1890_v34, %v800_v51  ;;  %v1686_v56 = vpop.f32.mrf.mxu0  ;;  %v1718_v61 = vpop.f32.mrf.mxu1 }
 0x10d   : > { %1317 = vst.msk [vmem:[%s1910_s6 + $0x68] sm:$0xf] %vm1290_vm1, %v1580_v47  ;;  %v1578_v57 = vpack.c.bf16 %v994_v48, %v994_v48  ;;  %v997_v58 = vmax.f32 %v933_v49, 0.0  ;;  %v931_v59 = vadd.f32 %v1895_v36, %v860_v50  ;;  %v865_v60 = vmul.f32 %v1686_v56, %v1890_v34 }
 0x10e   : > { %1349 = vst.msk [vmem:[%s1910_s6 + $0xe8] sm:$0xf] %vm1290_vm1, %v1612_v52  ;;  %v1610_v62 = vpack.c.bf16 %v1026_v53, %v1026_v53  ;;  %v1029_v63 = vmax.f32 %v965_v54, 0.0  ;;  %v963_v0 = vadd.f32 %v1895_v36, %v892_v55  ;;  %v897_v1 = vmul.f32 %v1718_v61, %v1890_v34  ;;  %v685_v2 = vpop.f32.mrf.mxu0  ;;  %v813_v7 = vpop.f32.mrf.mxu1 }
 0x10f   : > { %1315 = vst.msk [vmem:[%s1910_s6 + $0x60] sm:$0xf] %vm1290_vm1, %v1578_v57  ;;  %v1581_v3 = vpack.c.bf16 %v997_v58, %v997_v58  ;;  %v995_v4 = vmax.f32 %v931_v59, 0.0  ;;  %v936_v5 = vadd.f32 %v1895_v36, %v865_v60  ;;  %v863_v6 = vmul.f32 %v1890_v34, %v685_v2 }
 0x110   : > { %1347 = vst.msk [vmem:[%s1910_s6 + $0xe0] sm:$0xf] %vm1290_vm1, %v1610_v62  ;;  %v1613_v8 = vpack.c.bf16 %v1029_v63, %v1029_v63  ;;  %v1027_v9 = vmax.f32 %v963_v0, 0.0  ;;  %v968_v10 = vadd.f32 %v1895_v36, %v897_v1  ;;  %v895_v11 = vmul.f32 %v1890_v34, %v813_v7  ;;  %v1687_v12 = vpop.f32.mrf.mxu0  ;;  %v1719_v17 = vpop.f32.mrf.mxu1 }
 0x111   : > { %1318 = vst.msk [vmem:[%s1910_s6 + $0x6c] sm:$0xf] %vm1290_vm1, %v1581_v3  ;;  %v1579_v13 = vpack.c.bf16 %v995_v4, %v995_v4  ;;  %v1000_v14 = vmax.f32 %v936_v5, 0.0  ;;  %v934_v15 = vadd.f32 %v1895_v36, %v863_v6  ;;  %v866_v16 = vmul.f32 %v1687_v12, %v1890_v34 }
 0x112   : > { %1350 = vst.msk [vmem:[%s1910_s6 + $0xec] sm:$0xf] %vm1290_vm1, %v1613_v8  ;;  %v1611_v18 = vpack.c.bf16 %v1027_v9, %v1027_v9  ;;  %v1032_v19 = vmax.f32 %v968_v10, 0.0  ;;  %v966_v20 = vadd.f32 %v1895_v36, %v895_v11  ;;  %v898_v21 = vmul.f32 %v1719_v17, %v1890_v34  ;;  %v688_v22 = vpop.f32.mrf.mxu0  ;;  %v816_v27 = vpop.f32.mrf.mxu1 }
 0x113   : > { %1316 = vst.msk [vmem:[%s1910_s6 + $0x64] sm:$0xf] %vm1290_vm1, %v1579_v13  ;;  %v1584_v23 = vpack.c.bf16 %v1000_v14, %v1000_v14  ;;  %v998_v24 = vmax.f32 %v934_v15, 0.0  ;;  %v937_v25 = vadd.f32 %v1895_v36, %v866_v16  ;;  %v864_v26 = vmul.f32 %v1890_v34, %v688_v22 }
 0x114   : > { %1348 = vst.msk [vmem:[%s1910_s6 + $0xe4] sm:$0xf] %vm1290_vm1, %v1611_v18  ;;  %v1616_v28 = vpack.c.bf16 %v1032_v19, %v1032_v19  ;;  %v1030_v29 = vmax.f32 %v966_v20, 0.0  ;;  %v969_v30 = vadd.f32 %v1895_v36, %v898_v21  ;;  %v896_v31 = vmul.f32 %v1890_v34, %v816_v27 }
 0x115   : > { %1321 = vst.msk [vmem:[%s1910_s6 + $0x78] sm:$0xf] %vm1290_vm1, %v1584_v23  ;;  %v1582_v32 = vpack.c.bf16 %v998_v24, %v998_v24  ;;  %v1001_v33 = vmax.f32 %v937_v25, 0.0  ;;  %v935_v35 = vadd.f32 %v1895_v36, %v864_v26 }
 0x116   : > { %1353 = vst.msk [vmem:[%s1910_s6 + $0xf8] sm:$0xf] %vm1290_vm1, %v1616_v28  ;;  %v1614_v37 = vpack.c.bf16 %v1030_v29, %v1030_v29  ;;  %v1033_v38 = vmax.f32 %v969_v30, 0.0  ;;  %v967_v39 = vadd.f32 %v1895_v36, %v896_v31 }
 0x117   : > { %1319 = vst.msk [vmem:[%s1910_s6 + $0x70] sm:$0xf] %vm1290_vm1, %v1582_v32  ;;  %v1585_v40 = vpack.c.bf16 %v1001_v33, %v1001_v33  ;;  %v999_v41 = vmax.f32 %v935_v35, 0.0 }
 0x118   : > { %1351 = vst.msk [vmem:[%s1910_s6 + $0xf0] sm:$0xf] %vm1290_vm1, %v1614_v37  ;;  %v1617_v34 = vpack.c.bf16 %v1033_v38, %v1033_v38  ;;  %v1031_v42 = vmax.f32 %v967_v39, 0.0 }
 0x119   : > { %1322 = vst.msk [vmem:[%s1910_s6 + $0x7c] sm:$0xf] %vm1290_vm1, %v1585_v40  ;;  %v1583_v43 = vpack.c.bf16 %v999_v41, %v999_v41 }
 0x11a   : > { %1354 = vst.msk [vmem:[%s1910_s6 + $0xfc] sm:$0xf] %vm1290_vm1, %v1617_v34  ;;  %v1615_v44 = vpack.c.bf16 %v1031_v42, %v1031_v42 }
 0x11b   : > { %1320 = vst.msk [vmem:[%s1910_s6 + $0x74] sm:$0xf] %vm1290_vm1, %v1583_v43 }
 0x11c   : > { %1352 = vst.msk [vmem:[%s1910_s6 + $0xf4] sm:$0xf] %vm1290_vm1, %v1615_v44 }
 0x11d PF: > { %s14_s15 = sadd.s32 1, %s1772_s15  }
 0x11e   : > { %p11_p4 = scmp.ge.s32.totalorder %s14_s15, 6  }
 0x120   :  { %13 = sbr.rel (!%p11_p4) target bundleno = 1 (0x1), region = 66 }

</bundles_post_ra>
